<compile_context>
chip_gen: v7x
topology: tpu7x:2x2x1
jax: 0.10.0
libtpu: 0.0.40
codegen_flags: <defaults>
</compile_context>

<pallas_src>
from functools import partial

import jax
import jax.numpy as jnp
from jax import lax
from jax.experimental import pallas as pl
from jax.experimental.pallas import tpu as pltpu

_LANES = 128
_MAX_STRIP_ROWS = 256  # upper bound on rows per inner strip


def _vmem_limit_bytes():
    """Generation-aware scoped-VMEM limit (explicit, per perf review)."""
    cap = 64 << 20  # conservative fallback (v7x per-core physical VMEM)
    try:
        info = pltpu.get_tpu_info()
        cap = int(getattr(info, "vmem_capacity_bytes", cap))
    except Exception:
        pass
    # ~75% of physical VMEM: 96 MiB on v5e/v6e (128 MiB), 48 MiB on v7x (64 MiB).
    return min((cap * 3) // 4, 96 << 20)


def _padded_row_bytes(lane_width):
    return pl.cdiv(lane_width, _LANES) * _LANES * 4


def _strip_rows(lane_width, block_rows):
    """Rows per inner strip: ~128 KiB of x, so each strip is <= ~32 live f32 vregs."""
    rows = max(8, min(_MAX_STRIP_ROWS, (128 << 10) // _padded_row_bytes(lane_width)))
    rows = (rows // 8) * 8
    return max(1, min(rows, block_rows))


def _plan_block_rows(rows_total, lane_width, vmem_limit, row_override=None):
    """Rows of the (packed) x array per grid step, sized against the VMEM budget."""
    row_bytes = _padded_row_bytes(lane_width)
    # x-block budget: ~1/6 of the limit (2 x buffers + weight + output + headroom),
    # capped at 16 MiB -> 8-16 MiB blocks on v6e/v5e, ~8 MiB on v7x.
    budget = max(1 << 20, min(16 << 20, vmem_limit // 6))
    max_rows = max(8, budget // row_bytes)

    if row_override is not None:
        tr = max(1, min(row_override, rows_total))
    elif rows_total <= min(1024, max_rows):
        tr = rows_total  # single block: block dims == full array dims (always legal)
    else:
        tr = max(8, (max_rows // 8) * 8)
        # >= 4 grid steps on large batches: with ("parallel",) each v7x TensorCore
        # gets >= 2 steps, so the reduce epilogue hides under the next block's DMA.
        quarter = max(256, ((rows_total // 4) // 8) * 8)
        tr = min(tr, quarter)

    if tr < rows_total:
        tr = max(8, (tr // 8) * 8)  # partial blocks need an 8-aligned row count
    else:
        tr = rows_total
    return tr


def _make_kernel(*, k, seg, strip, n_full, rem):
    """Kernel closure.  k packed rows per 128-lane row (k == 1 -> plain path)."""
    lanes = k * seg if k > 1 else None

    def kernel(x_ref, w_ref, b_ref, o_ref):
        # x_ref: (TR, lane_width) VMEM (streamed)
        # w_ref: (1, lane_width)  VMEM (resident across the grid)
        # b_ref: (1,)             SMEM scalar
        # o_ref: (1, k, TR)       VMEM, lane-dense output rows
        w = w_ref[...]
        b = b_ref[0]

        def process(r0, nrows):
            xs = x_ref[pl.ds(r0, nrows), :]          # (nrows, lane_width)
            prod = xs * w                            # VPU broadcast multiply
            if k == 1:
                row = jnp.sum(prod, axis=1)          # XLU lane reduce -> (nrows,)
                o_ref[0, 0, pl.ds(r0, nrows)] = (row + b).astype(o_ref.dtype)
            else:
                # Segmented (length-`seg`) in-lane reduce: log2(seg) roll+add steps
                # shared by all k packed rows of each vreg.  Afterwards the sum of
                # lanes [s*seg, (s+1)*seg) sits at lane s*seg (those lanes never see
                # the circular wrap since (k-1)*seg + seg - 1 < lanes).
                acc = prod
                shift = 1
                while shift < seg:
                    acc = acc + pltpu.roll(acc, lanes - shift, axis=1)
                    shift *= 2
                for s in range(k):
                    col = acc[:, s * seg]            # (nrows,) dot products of segment s
                    o_ref[0, s, pl.ds(r0, nrows)] = (col + b).astype(o_ref.dtype)

        # Strip loop bounds live values (no block-sized product is materialized).
        if n_full == 1:
            process(0, strip)
        elif n_full > 1:
            def strip_body(i, carry):
                process(pl.multiple_of(i * strip, strip), strip)
                return carry
            lax.fori_loop(0, n_full, strip_body, None)
        if rem:
            process(n_full * strip, rem)

    return kernel


@partial(jax.jit, static_argnames=("block_rows", "pack_lanes"))
def loglinear_forward(x, weight, bias, *, block_rows=None, pack_lanes=True):
    """x: (B, D) f32; weight: (1, D) f32 (PyTorch nn.Linear layout); bias: (1,) f32."""
    B, D = x.shape
    assert weight.shape == (1, D) and bias.shape == (1,)

    # Small-D lane packing: fold k = 128 // D logical rows into one 128-lane row.
    k = 1
    if pack_lanes and 8 <= D < _LANES and _LANES % D == 0 and B % (_LANES // D) == 0:
        k = _LANES // D
    rows = B // k            # packed rows
    lanes = k * D            # packed lane width

    x_view = x.reshape(rows, lanes)                       # free: contiguous row-major
    w_eff = jnp.tile(weight, (1, k)) if k > 1 else weight  # (1, lanes)

    vmem_limit = _vmem_limit_bytes()
    row_override = None if block_rows is None else max(1, block_rows // k)
    tr = _plan_block_rows(rows, lanes, vmem_limit, row_override)
    strip = _strip_rows(lanes, tr)
    n_full, rem = tr // strip, tr % strip
    num_tiles = pl.cdiv(rows, tr)

    kernel = _make_kernel(k=k, seg=D, strip=strip, n_full=n_full, rem=rem)

    out = pl.pallas_call(
        kernel,
        out_shape=jax.ShapeDtypeStruct((num_tiles, k, tr), x.dtype),
        grid=(num_tiles,),
        in_specs=[
            pl.BlockSpec((tr, lanes), lambda i: (i, 0)),           # x (streamed)
            pl.BlockSpec((1, lanes), lambda i: (0, 0)),            # weight (resident)
            pl.BlockSpec(memory_space=pltpu.MemorySpace.SMEM),     # bias (SMEM scalar)
        ],
        # Lane-dense output block (k sublanes x tr lanes): unmasked stores and a dense
        # writeback DMA.  A (tr, k) block would pad to (tr, 128) in VMEM and write
        # 16-byte strided DMA lines.
        out_specs=pl.BlockSpec((1, k, tr), lambda i: (i, 0, 0)),
        compiler_params=pltpu.CompilerParams(
            dimension_semantics=("parallel",),
            vmem_limit_bytes=int(vmem_limit),
        ),
    )(x_view, w_eff, bias)

    # out[i, s, p] is the logit of logical row (i*tr + p)*k + s.
    out = jnp.transpose(out, (0, 2, 1)).reshape(-1)[:B]
    return out.reshape(B, 1)


def loglinear_predict(x, weight, bias, **kw):
    """Mirrors LogLinear.predict: sigmoid(z) > 0.5  <=>  z > 0 (threshold on logits)."""
    logits = loglinear_forward(x, weight, bias, **kw)
    return (logits > 0).astype(jnp.int32).reshape(-1)


def reference_forward(x, weight, bias):
    # Elementwise + reduce reference (avoids TPU matmul precision modes).
    return jnp.sum(x * weight, axis=-1, keepdims=True) + bias[None, :]


if __name__ == "__main__":
    key = jax.random.PRNGKey(0)
    k_w, k_b, k1, k2, k3, k4 = jax.random.split(key, 6)

    def check(x, w, b, **kw):
        out = jax.block_until_ready(loglinear_forward(x, w, b, **kw))
        ref = reference_forward(x, w, b)
        assert out.shape == ref.shape, (out.shape, ref.shape)
        assert jnp.allclose(out, ref, atol=2e-5, rtol=2e-5), float(
            jnp.max(jnp.abs(out - ref))
        )
        return out

    def make_params(dim, kw, kb):
        bound = 1.0 / jnp.sqrt(dim)
        w = jax.random.uniform(kw, (1, dim), jnp.float32, -bound, bound)
        b = jax.random.uniform(kb, (1,), jnp.float32, -bound, bound)
        return w, b

    # 1) Packed small-D path (D=32 -> 4 rows per 128-lane row), single block.
    D = 32
    weight, bias = make_params(D, k_w, k_b)
    x1 = jax.random.normal(k1, (16, D), jnp.float32)
    out1 = check(x1, weight, bias)

    # 2) Packed path, multiple tiles + tail (batch not a multiple of the block).
    x2 = jax.random.normal(k2, (200, D), jnp.float32)
    check(x2, weight, bias, block_rows=64)

    # 3) Unpacked fallback on the same small-D data (pack_lanes disabled).
    check(x1, weight, bias, pack_lanes=False)

    # 4) Unpacked path with D >= 128 (full-lane rows), single block.
    D4 = 256
    w4, b4 = make_params(D4, k3, k_b)
    x4 = jax.random.normal(k3, (96, D4), jnp.float32)
    check(x4, w4, b4)

    # 5) Unpacked path with D not a multiple of 128 and a partial last block
    #    (hardware test for lane/row padding, per the review's correctness note).
    D5 = 100
    w5, b5 = make_params(D5, k4, k_b)
    x5 = jax.random.normal(k4, (40, D5), jnp.float32)
    check(x5, w5, b5, block_rows=16)

    # 6) predict(): threshold on logits (== sigmoid > 0.5).
    preds = jax.block_until_ready(loglinear_predict(x1, weight, bias))
    ref_preds = (reference_forward(x1, weight, bias) > 0).astype(jnp.int32).reshape(-1)
    assert preds.shape == (16,) and preds.dtype == jnp.int32
    assert jnp.array_equal(preds, ref_preds)

    print("KERNEL_OK")
</pallas_src>

<mosaic_0001>
module attributes {stable_mosaic.version = 11 : i64} {
  func.func @kernel(%arg0: i32, %arg1: memref<4x128xf32, #tpu.memory_space<vmem>>, %arg2: memref<1x128xf32, #tpu.memory_space<vmem>>, %arg3: memref<1xf32, #tpu.memory_space<smem>>, %arg4: memref<1x4x4xf32, #tpu.memory_space<vmem>>) attributes {dimension_semantics = [#tpu.dimension_semantics<parallel>], iteration_bounds = array<i64: 1>, scalar_prefetch = 0 : i64, scratch_operands = 0 : i64, tpu.core_type = #tpu.core_type<tc>, window_params = [{transform_indices = @transform_0, window_bounds = array<i64: 4, 128>}, {pipeline_mode = #tpu.pipeline_mode<synchronous>, transform_indices = @transform_1, window_bounds = array<i64: 1, 128>}, {transform_indices = @transform_2, window_bounds = array<i64: 1>}, {transform_indices = @transform_3, window_bounds = array<i64: 1, 4, 4>}]} {
    %c0 = arith.constant 0 : index
    %c0_0 = arith.constant 0 : index
    %0 = vector.load %arg2[%c0, %c0_0] : memref<1x128xf32, #tpu.memory_space<vmem>>, vector<1x128xf32>
    %c0_1 = arith.constant 0 : index
    %1 = memref.load %arg3[%c0_1] : memref<1xf32, #tpu.memory_space<smem>>
    %c0_2 = arith.constant 0 : index
    %c0_3 = arith.constant 0 : index
    %2 = vector.load %arg1[%c0_2, %c0_3] : memref<4x128xf32, #tpu.memory_space<vmem>>, vector<4x128xf32>
    %3 = vector.broadcast %0 : vector<1x128xf32> to vector<4x128xf32>
    %4 = arith.mulf %2, %3 : vector<4x128xf32>
    %c127_i32 = arith.constant 127 : i32
    %5 = tpu.dynamic_rotate %4 by %c127_i32 dim 1 : vector<4x128xf32>, i32 -> vector<4x128xf32>
    %6 = arith.addf %4, %5 : vector<4x128xf32>
    %c126_i32 = arith.constant 126 : i32
    %7 = tpu.dynamic_rotate %6 by %c126_i32 dim 1 : vector<4x128xf32>, i32 -> vector<4x128xf32>
    %8 = arith.addf %6, %7 : vector<4x128xf32>
    %c124_i32 = arith.constant 124 : i32
    %9 = tpu.dynamic_rotate %8 by %c124_i32 dim 1 : vector<4x128xf32>, i32 -> vector<4x128xf32>
    %10 = arith.addf %8, %9 : vector<4x128xf32>
    %c120_i32 = arith.constant 120 : i32
    %11 = tpu.dynamic_rotate %10 by %c120_i32 dim 1 : vector<4x128xf32>, i32 -> vector<4x128xf32>
    %12 = arith.addf %10, %11 : vector<4x128xf32>
    %c112_i32 = arith.constant 112 : i32
    %13 = tpu.dynamic_rotate %12 by %c112_i32 dim 1 : vector<4x128xf32>, i32 -> vector<4x128xf32>
    %14 = arith.addf %12, %13 : vector<4x128xf32>
    %15 = vector.extract_strided_slice %14 {offsets = [0, 0], sizes = [4, 1], strides = [1, 1]} : vector<4x128xf32> to vector<4x1xf32>
    %16 = vector.shape_cast %15 : vector<4x1xf32> to vector<4xf32>
    %17 = vector.broadcast %1 : f32 to vector<4xf32>
    %18 = arith.addf %16, %17 : vector<4xf32>
    %c0_4 = arith.constant 0 : index
    %c0_5 = arith.constant 0 : index
    %c0_6 = arith.constant 0 : index
    %19 = vector.load %arg4[%c0_4, %c0_5, %c0_6] : memref<1x4x4xf32, #tpu.memory_space<vmem>>, vector<1x1x4xf32>
    %20 = vector.shape_cast %19 : vector<1x1x4xf32> to vector<4xf32>
    %21 = vector.shape_cast %18 : vector<4xf32> to vector<1x1x4xf32>
    tpu.vector_store %arg4[%c0_4, %c0_5, %c0_6], %21 {strides = array<i32>} : memref<1x4x4xf32, #tpu.memory_space<vmem>>, vector<1x1x4xf32>,
    %22 = vector.extract_strided_slice %14 {offsets = [0, 32], sizes = [4, 1], strides = [1, 1]} : vector<4x128xf32> to vector<4x1xf32>
    %23 = vector.shape_cast %22 : vector<4x1xf32> to vector<4xf32>
    %24 = vector.broadcast %1 : f32 to vector<4xf32>
    %25 = arith.addf %23, %24 : vector<4xf32>
    %c0_7 = arith.constant 0 : index
    %c1 = arith.constant 1 : index
    %c0_8 = arith.constant 0 : index
    %26 = vector.load %arg4[%c0_7, %c1, %c0_8] : memref<1x4x4xf32, #tpu.memory_space<vmem>>, vector<1x1x4xf32>
    %27 = vector.shape_cast %26 : vector<1x1x4xf32> to vector<4xf32>
    %28 = vector.shape_cast %25 : vector<4xf32> to vector<1x1x4xf32>
    tpu.vector_store %arg4[%c0_7, %c1, %c0_8], %28 {strides = array<i32>} : memref<1x4x4xf32, #tpu.memory_space<vmem>>, vector<1x1x4xf32>,
    %29 = vector.extract_strided_slice %14 {offsets = [0, 64], sizes = [4, 1], strides = [1, 1]} : vector<4x128xf32> to vector<4x1xf32>
    %30 = vector.shape_cast %29 : vector<4x1xf32> to vector<4xf32>
    %31 = vector.broadcast %1 : f32 to vector<4xf32>
    %32 = arith.addf %30, %31 : vector<4xf32>
    %c0_9 = arith.constant 0 : index
    %c2 = arith.constant 2 : index
    %c0_10 = arith.constant 0 : index
    %33 = vector.load %arg4[%c0_9, %c2, %c0_10] : memref<1x4x4xf32, #tpu.memory_space<vmem>>, vector<1x1x4xf32>
    %34 = vector.shape_cast %33 : vector<1x1x4xf32> to vector<4xf32>
    %35 = vector.shape_cast %32 : vector<4xf32> to vector<1x1x4xf32>
    tpu.vector_store %arg4[%c0_9, %c2, %c0_10], %35 {strides = array<i32>} : memref<1x4x4xf32, #tpu.memory_space<vmem>>, vector<1x1x4xf32>,
    %36 = vector.extract_strided_slice %14 {offsets = [0, 96], sizes = [4, 1], strides = [1, 1]} : vector<4x128xf32> to vector<4x1xf32>
    %37 = vector.shape_cast %36 : vector<4x1xf32> to vector<4xf32>
    %38 = vector.broadcast %1 : f32 to vector<4xf32>
    %39 = arith.addf %37, %38 : vector<4xf32>
    %c0_11 = arith.constant 0 : index
    %c3 = arith.constant 3 : index
    %c0_12 = arith.constant 0 : index
    %40 = vector.load %arg4[%c0_11, %c3, %c0_12] : memref<1x4x4xf32, #tpu.memory_space<vmem>>, vector<1x1x4xf32>
    %41 = vector.shape_cast %40 : vector<1x1x4xf32> to vector<4xf32>
    %42 = vector.shape_cast %39 : vector<4xf32> to vector<1x1x4xf32>
    tpu.vector_store %arg4[%c0_11, %c3, %c0_12], %42 {strides = array<i32>} : memref<1x4x4xf32, #tpu.memory_space<vmem>>, vector<1x1x4xf32>,
    return
  }
  func.func @transform_0(%arg0: i32) -> (i32, i32) {
    %c0_i32 = arith.constant 0 : i32
    %c0_i32_0 = arith.constant 0 : i32
    return %arg0, %c0_i32 : i32, i32
  }
  func.func @transform_1(%arg0: i32) -> (i32, i32) {
    %c0_i32 = arith.constant 0 : i32
    %c0_i32_0 = arith.constant 0 : i32
    %c0_i32_1 = arith.constant 0 : i32
    return %c0_i32, %c0_i32_0 : i32, i32
  }
  func.func @transform_2(%arg0: i32) -> i32 {
    %c0_i32 = arith.constant 0 : i32
    %c0_i32_0 = arith.constant 0 : i32
    return %c0_i32 : i32
  }
  func.func @transform_3(%arg0: i32) -> (i32, i32, i32) {
    %c0_i32 = arith.constant 0 : i32
    %c0_i32_0 = arith.constant 0 : i32
    %c0_i32_1 = arith.constant 0 : i32
    return %arg0, %c0_i32, %c0_i32_0 : i32, i32, i32
  }
}

</mosaic_0001>

<bundles_post_ra>
// kernel: loglinear_forward.1
= control target key start
LH: loop header
LB: loop body
LE: loop exit
PB: predicated region body
PF: predicated region fallthrough
CT: control target
= control target key end

     0   :  { %s101_s16 = smov 127   ;;  %s102_s17 = smov 126   ;;  %v105_v9 = vmov 32   ;;  %v106_v10 = vmov 0   ;;  %v108_v17 = vmov 64   ;;  %v109_v18 = vmov 96   ;;  %s151_s0 = inlined_call_operand.vmem [shape: f32[4,128], index: 0, kind: input, shape index: {}]   ;;  %s152_s1 = inlined_call_operand.vmem [shape: f32[1,128], index: 1, kind: input, shape index: {}]   ;;  %s153_s2 = inlined_call_operand.<no memory space> [shape: f32[1], index: 2, kind: input, shape index: {}]   ;;  %s154_s3 = inlined_call_operand.vmem [shape: f32[1,4,4], index: 3, kind: output, shape index: {}]  }
   0x1   :  { %v86_v0 = vld [vmem:[%s152_s1] ss:$0 sm:$0xff]  ;;  %s103_s18 = smov 124   ;;  %s104_s19 = smov 120   ;;  %97 = vset.pattern.permute.xlu0 %v105_v9  ;;  %96 = vset.pattern.permute.xlu1 %v106_v10  ;;  %v40_v13 = vstv %s153_s2  ;;  %v46_v19 = vlaneseq  ;;  %vm53_vm0 = vcmask 24576  }
   0x2   :  { %v17_v1 = vld [vmem:[%s151_s0] sm:$0xf]  ;;  %s107_s0 = smov 112  }
   0x3   :  { %v24_v2 = vmul.f32 %v86_v0, %v17_v1  ;;  %v47_v20 = vand.u32 127, %v46_v19  ;;  %v49_v21 = vshrl.u32 %v46_v19, 7 }
   0x5   :  { %25 = vrot.lane.b32.xlu0 %v24_v2, %s101_s16  ;;  %v50_v22 = vsub.s32 %v47_v20, %v49_v21 }
  0x77   :  { %v26_v3 = vpop.permute.xlu0 %25 }
  0x78   :  { %v27_v4 = vadd.f32 %v26_v3, %v24_v2 }
  0x7a   :  { %28 = vrot.lane.b32.xlu0 %v27_v4, %s102_s17 }
  0xec   :  { %v29_v5 = vpop.permute.xlu0 %28 }
  0xed   :  { %v30_v6 = vadd.f32 %v29_v5, %v27_v4 }
  0xef   :  { %31 = vrot.lane.b32.xlu1 %v30_v6, %s103_s18 }
 0x161   :  { %v32_v7 = vpop.permute.xlu1 %31 }
 0x162   :  { %v33_v8 = vadd.f32 %v32_v7, %v30_v6 }
 0x164   :  { %34 = vrot.lane.b32.xlu1 %v33_v8, %s104_s19 }
 0x1d6   :  { %v35_v11 = vpop.permute.xlu1 %34 }
 0x1d7   :  { %v36_v12 = vadd.f32 %v35_v11, %v33_v8 }
 0x1d9   :  { %37 = vrot.lane.b32.xlu0 %v36_v12, %s107_s0 }
 0x24b   :  { %v38_v14 = vpop.permute.xlu0 %37 }
 0x24c   :  { %v39_v15 = vadd.f32 %v38_v14, %v36_v12 }
 0x24e   :  { %v41_v16 = vadd.f32 %v40_v13, %v39_v15 }
 0x250   :  { %56 = vperm.xlu0 %97, %v41_v16   ;;  %44 = vperm.xlu1 %96, %v41_v16  }
 0x254   :  { %98 = vset.pattern.permute.xlu1 %v108_v17  ;;  %100 = vset.pattern.permute.xlu0 %v109_v18 }
 0x255   :  { %65 = vperm.xlu1 %98, %v41_v16  }
 0x259   :  { %99 = vset.pattern.permute.xlu1 %v109_v18 }
 0x25a   :  { %74 = vperm.xlu1 %99, %v41_v16  }
 0x2cf   :  { %v57_v23 = vpop.permute.xlu0 %56  ;;  %v45_v24 = vpop.permute.xlu1 %44 }
 0x2d0   :  { %v61_v25 = vrot.slane %v57_v23, %v50_v22  ;;  %v51_v26 = vrot.slane %v45_v24, %v50_v22 }
 0x2d2   :  { %63 = vst.msk [vmem:[%s154_s3 + $0x1] sm:$0x1] %vm53_vm0, %v61_v25  ;;  %54 = vst.msk [vmem:[%s154_s3] sm:$0x1] %vm53_vm0, %v51_v26 }
 0x2d4   :  { %v66_v27 = vpop.permute.xlu1 %65 }
 0x2d5   :  { %v70_v28 = vrot.slane %v66_v27, %v50_v22 }
 0x2d7   :  { %72 = vst.msk [vmem:[%s154_s3 + $0x2] sm:$0x1] %vm53_vm0, %v70_v28 }
 0x2d9   :  { %v75_v29 = vpop.permute.xlu1 %74 }
 0x2da   :  { %v79_v30 = vrot.slane %v75_v29, %v50_v22 }
 0x2dc   :  { %81 = vst.msk [vmem:[%s154_s3 + $0x3] sm:$0x1] %vm53_vm0, %v79_v30 }

</bundles_post_ra>
